<compile_context>
chip_gen: v5e
topology: v5e:2x2
jax: 0.10.0
libtpu: 0.0.40
codegen_flags: <defaults>
</compile_context>

<pallas_src>
import functools

import jax
import jax.numpy as jnp
from jax.experimental import pallas as pl

HIDDEN = 1080          # logical hidden size (construct input dim)
H_PAD = 1152           # 1080 padded up to a multiple of 128
N_PAD = 128            # lane-dense construct output (win_size <= 128)
VIT_OUT = 128          # VITST stand-in output width


# ----------------------------- Pallas kernel -------------------------------
def _fused_kernel(x_ref, gw_ref, gb_ref, cw_ref, cb_ref,
                  pic_ref, vw_ref, vb_ref,
                  o_raw_ref, o_time_ref, o_pic_ref):
    # GPT stand-in: (B*C, L) @ (L, H_PAD) + b, f32 MXU accumulate.
    h = jnp.dot(x_ref[...], gw_ref[...],
                preferred_element_type=jnp.float32) + gb_ref[...]
    o_raw_ref[...] = h.astype(o_raw_ref.dtype)

    # construct: (B*C, H_PAD) @ (H_PAD, N_PAD) + b -- consumes the VMEM-resident
    # intermediate directly (no HBM round-trip).
    t = jnp.dot(h, cw_ref[...],
                preferred_element_type=jnp.float32) + cb_ref[...]
    o_time_ref[...] = t.astype(o_time_ref.dtype)

    # VITST stand-in: (B, 3*H*W) @ (3*H*W, 128) + b.
    p = jnp.dot(pic_ref[...], vw_ref[...],
                preferred_element_type=jnp.float32) + vb_ref[...]
    o_pic_ref[...] = p.astype(o_pic_ref.dtype)


def _full_spec(shape):
    # Whole-array block, no grid: index_map takes zero grid indices.
    return pl.BlockSpec(shape, lambda: (0,) * len(shape))


def fused_forward_matmuls(x, gw, gb, cw, cb, pic, vw, vb):
    """One pallas_call emitting (o_raw_padded, o_time_padded, o_pic)."""
    m1, _ = x.shape
    _, hp = gw.shape
    _, npad = cw.shape
    b, _ = pic.shape
    _, v = vw.shape
    out_shape = (
        jax.ShapeDtypeStruct((m1, hp), x.dtype),
        jax.ShapeDtypeStruct((m1, npad), x.dtype),
        jax.ShapeDtypeStruct((b, v), x.dtype),
    )
    return pl.pallas_call(
        _fused_kernel,
        out_shape=out_shape,
        in_specs=[_full_spec(x.shape), _full_spec(gw.shape), _full_spec(gb.shape),
                  _full_spec(cw.shape), _full_spec(cb.shape),
                  _full_spec(pic.shape), _full_spec(vw.shape), _full_spec(vb.shape)],
        out_specs=(_full_spec((m1, hp)), _full_spec((m1, npad)),
                   _full_spec((b, v))),
    )(x, gw, gb, cw, cb, pic, vw, vb)


# ------------------------------ Parameters ---------------------------------
def make_params(key, *, win_size, L, pic_flat):
    """Deterministic params, pre-padded / pre-reshaped once at init."""
    assert win_size <= N_PAD
    k1, k2, k3, k4, k5, k6 = jax.random.split(key, 6)

    gpt_w = jax.random.normal(k1, (L, HIDDEN), jnp.float32) * 0.02
    gpt_b = jax.random.normal(k2, (HIDDEN,), jnp.float32) * 0.02
    vit_w = jax.random.normal(k3, (pic_flat, VIT_OUT), jnp.float32) * 0.02
    vit_b = jax.random.normal(k4, (VIT_OUT,), jnp.float32) * 0.02
    con_w = jax.random.normal(k5, (HIDDEN, win_size), jnp.float32) * 0.02
    con_b = jax.random.normal(k6, (win_size,), jnp.float32) * 0.02

    # Zero-pad to 128-aligned shapes (done once; padding is mathematically inert).
    gpt_w_pad = jnp.zeros((L, H_PAD), jnp.float32).at[:, :HIDDEN].set(gpt_w)
    gpt_b_pad = jnp.zeros((1, H_PAD), jnp.float32).at[:, :HIDDEN].set(gpt_b)
    con_w_pad = jnp.zeros((H_PAD, N_PAD), jnp.float32).at[:HIDDEN, :win_size].set(con_w)
    con_b_pad = jnp.zeros((1, N_PAD), jnp.float32).at[:, :win_size].set(con_b)
    vit_b2 = vit_b.reshape(1, VIT_OUT)

    return {
        "gpt_w": gpt_w_pad, "gpt_b": gpt_b_pad,
        "con_w": con_w_pad, "con_b": con_b_pad,
        "vit_w": vit_w, "vit_b": vit_b2,
    }


# ------------------------------ Forward pass --------------------------------
@functools.partial(jax.jit, static_argnames=("win_size",))
def model_forward(params, raw, picture, *, win_size):
    B, L, C = raw.shape

    # GPT stand-in input: (B, L, C) -> (B, C, L) -> (B*C, L)
    x = jnp.transpose(raw, (0, 2, 1)).reshape(B * C, L)
    # VITST stand-in input: flatten picture (NCHW) -> (B, 3*H*W)
    pic = picture.reshape(B, -1)

    o_raw_pad, o_time_pad, o_pic = fused_forward_matmuls(
        x, params["gpt_w"], params["gpt_b"],
        params["con_w"], params["con_b"],
        pic, params["vit_w"], params["vit_b"])

    output_raw = o_raw_pad[:, :HIDDEN].reshape(B, C, HIDDEN)
    output_picture = o_pic
    # torch: output_time.reshape(B, C, L).transpose(1, 2)  (requires win_size == L)
    output_time = o_time_pad[:, :win_size].reshape(B, C, win_size)
    output_time = jnp.transpose(output_time, (0, 2, 1))
    return output_raw, output_picture, output_time


def model_forward_ref(params, raw, picture, *, win_size):
    """Plain-jnp reference (same math, no Pallas) for correctness check."""
    B, L, C = raw.shape
    x = jnp.transpose(raw, (0, 2, 1)).reshape(B * C, L)
    pic = picture.reshape(B, -1)
    h = x @ params["gpt_w"] + params["gpt_b"]
    t = h @ params["con_w"] + params["con_b"]
    p = pic @ params["vit_w"] + params["vit_b"]
    out_raw = h[:, :HIDDEN].reshape(B, C, HIDDEN)
    out_time = jnp.transpose(t[:, :win_size].reshape(B, C, win_size), (0, 2, 1))
    return out_raw, p, out_time


# --------------------------------- main -------------------------------------
if __name__ == "__main__":
    key = jax.random.PRNGKey(0)
    k_raw, k_pic, k_par = jax.random.split(key, 3)

    B, L, C = 2, 8, 4          # batch=2, seq(win_size)=8, channels=4
    H = W = 16                 # small picture
    win_size = L

    raw = jax.random.normal(k_raw, (B, L, C), jnp.float32)
    picture = jax.random.normal(k_pic, (B, 3, H, W), jnp.float32)  # NCHW

    params = make_params(k_par, win_size=win_size, L=L, pic_flat=3 * H * W)

    out_raw, out_pic, out_time = model_forward(params, raw, picture,
                                               win_size=win_size)
    jax.block_until_ready((out_raw, out_pic, out_time))

    assert out_raw.shape == (B, C, HIDDEN)
    assert out_pic.shape == (B, VIT_OUT)
    assert out_time.shape == (B, L, C)

    # Correctness check against a plain-jnp reference.
    ref_raw, ref_pic, ref_time = model_forward_ref(params, raw, picture,
                                                   win_size=win_size)
    assert jnp.allclose(out_raw, ref_raw, rtol=5e-2, atol=1e-3)
    assert jnp.allclose(out_pic, ref_pic, rtol=5e-2, atol=1e-3)
    assert jnp.allclose(out_time, ref_time, rtol=5e-2, atol=1e-3)

    print("KERNEL_OK")
</pallas_src>

<mosaic_0001>
module attributes {stable_mosaic.version = 11 : i64} {
  func.func @_fused_kernel(%arg0: memref<8x8xf32, #tpu.memory_space<vmem>>, %arg1: memref<8x1152xf32, #tpu.memory_space<vmem>>, %arg2: memref<1x1152xf32, #tpu.memory_space<vmem>>, %arg3: memref<1152x128xf32, #tpu.memory_space<vmem>>, %arg4: memref<1x128xf32, #tpu.memory_space<vmem>>, %arg5: memref<2x768xf32, #tpu.memory_space<vmem>>, %arg6: memref<768x128xf32, #tpu.memory_space<vmem>>, %arg7: memref<1x128xf32, #tpu.memory_space<vmem>>, %arg8: memref<8x1152xf32, #tpu.memory_space<vmem>>, %arg9: memref<8x128xf32, #tpu.memory_space<vmem>>, %arg10: memref<2x128xf32, #tpu.memory_space<vmem>>) attributes {dimension_semantics = [], scalar_prefetch = 0 : i64, scratch_operands = 0 : i64, tpu.core_type = #tpu.core_type<tc>} {
    %c0 = arith.constant 0 : index
    %c0_0 = arith.constant 0 : index
    %0 = vector.load %arg0[%c0, %c0_0] : memref<8x8xf32, #tpu.memory_space<vmem>>, vector<8x8xf32>
    %c0_1 = arith.constant 0 : index
    %c0_2 = arith.constant 0 : index
    %1 = vector.load %arg1[%c0_1, %c0_2] : memref<8x1152xf32, #tpu.memory_space<vmem>>, vector<8x1152xf32>
    %cst = arith.constant dense<0.000000e+00> : vector<8x1152xf32>
    %2 = tpu.matmul %0, %1, %cst {dimension_numbers = #tpu.dot_dimension_numbers<[1], [0], [0], [1], [0, 0, 1, 1], [], []>} : vector<8x8xf32>, vector<8x1152xf32>, vector<8x1152xf32> -> vector<8x1152xf32>
    %c0_3 = arith.constant 0 : index
    %c0_4 = arith.constant 0 : index
    %3 = vector.load %arg2[%c0_3, %c0_4] : memref<1x1152xf32, #tpu.memory_space<vmem>>, vector<1x1152xf32>
    %4 = vector.broadcast %3 : vector<1x1152xf32> to vector<8x1152xf32>
    %5 = arith.addf %2, %4 : vector<8x1152xf32>
    %c0_5 = arith.constant 0 : index
    %c0_6 = arith.constant 0 : index
    %6 = vector.load %arg8[%c0_5, %c0_6] : memref<8x1152xf32, #tpu.memory_space<vmem>>, vector<8x1152xf32>
    tpu.vector_store %arg8[%c0_5, %c0_6], %5 {strides = array<i32>} : memref<8x1152xf32, #tpu.memory_space<vmem>>, vector<8x1152xf32>,
    %c0_7 = arith.constant 0 : index
    %c0_8 = arith.constant 0 : index
    %7 = vector.load %arg3[%c0_7, %c0_8] : memref<1152x128xf32, #tpu.memory_space<vmem>>, vector<1152x128xf32>
    %cst_9 = arith.constant dense<0.000000e+00> : vector<8x128xf32>
    %8 = tpu.matmul %5, %7, %cst_9 {dimension_numbers = #tpu.dot_dimension_numbers<[1], [0], [0], [1], [0, 0, 1, 1], [], []>} : vector<8x1152xf32>, vector<1152x128xf32>, vector<8x128xf32> -> vector<8x128xf32>
    %c0_10 = arith.constant 0 : index
    %c0_11 = arith.constant 0 : index
    %9 = vector.load %arg4[%c0_10, %c0_11] : memref<1x128xf32, #tpu.memory_space<vmem>>, vector<1x128xf32>
    %10 = vector.broadcast %9 : vector<1x128xf32> to vector<8x128xf32>
    %11 = arith.addf %8, %10 : vector<8x128xf32>
    %c0_12 = arith.constant 0 : index
    %c0_13 = arith.constant 0 : index
    %12 = vector.load %arg9[%c0_12, %c0_13] : memref<8x128xf32, #tpu.memory_space<vmem>>, vector<8x128xf32>
    tpu.vector_store %arg9[%c0_12, %c0_13], %11 {strides = array<i32>} : memref<8x128xf32, #tpu.memory_space<vmem>>, vector<8x128xf32>,
    %c0_14 = arith.constant 0 : index
    %c0_15 = arith.constant 0 : index
    %13 = vector.load %arg5[%c0_14, %c0_15] : memref<2x768xf32, #tpu.memory_space<vmem>>, vector<2x768xf32>
    %c0_16 = arith.constant 0 : index
    %c0_17 = arith.constant 0 : index
    %14 = vector.load %arg6[%c0_16, %c0_17] : memref<768x128xf32, #tpu.memory_space<vmem>>, vector<768x128xf32>
    %cst_18 = arith.constant dense<0.000000e+00> : vector<2x128xf32>
    %15 = tpu.matmul %13, %14, %cst_18 {dimension_numbers = #tpu.dot_dimension_numbers<[1], [0], [0], [1], [0, 0, 1, 1], [], []>} : vector<2x768xf32>, vector<768x128xf32>, vector<2x128xf32> -> vector<2x128xf32>
    %c0_19 = arith.constant 0 : index
    %c0_20 = arith.constant 0 : index
    %16 = vector.load %arg7[%c0_19, %c0_20] : memref<1x128xf32, #tpu.memory_space<vmem>>, vector<1x128xf32>
    %17 = vector.broadcast %16 : vector<1x128xf32> to vector<2x128xf32>
    %18 = arith.addf %15, %17 : vector<2x128xf32>
    %c0_21 = arith.constant 0 : index
    %c0_22 = arith.constant 0 : index
    %19 = vector.load %arg10[%c0_21, %c0_22] : memref<2x128xf32, #tpu.memory_space<vmem>>, vector<2x128xf32>
    tpu.vector_store %arg10[%c0_21, %c0_22], %18 {strides = array<i32>} : memref<2x128xf32, #tpu.memory_space<vmem>>, vector<2x128xf32>,
    return
  }
}

</mosaic_0001>

<bundles_post_ra>
// kernel: model_forward.1
= control target key start
LH: loop header
LB: loop body
LE: loop exit
PB: predicated region body
PF: predicated region fallthrough
CT: control target
= control target key end

     0   :  { %16 = vsyncpa [#allocation3], 0  ;;  %s1198_s0 = inlined_call_operand.vmem [shape: f32[8,8], index: 0, kind: input, shape index: {}]   ;;  %s1199_s1 = inlined_call_operand.vmem [shape: f32[8,1152], index: 1, kind: input, shape index: {}]   ;;  %s1200_s2 = inlined_call_operand.vmem [shape: f32[1,1152], index: 2, kind: input, shape index: {}]   ;;  %s1201_s3 = inlined_call_operand.hbm [shape: f32[1152,128], index: 3, kind: input, shape index: {}]   ;;  %s1202_s4 = inlined_call_operand.vmem [shape: f32[1,128], index: 4, kind: input, shape index: {}]   ;;  %s1203_s5 = inlined_call_operand.vmem [shape: f32[2,768], index: 5, kind: input, shape index: {}]   ;;  %s1204_s6 = inlined_call_operand.hbm [shape: f32[768,128], index: 6, kind: input, shape index: {}]   ;;  %s1205_s7 = inlined_call_operand.vmem [shape: f32[1,128], index: 7, kind: input, shape index: {}]   ;;  %s1206_s8 = inlined_call_operand.vmem [shape: f32[8,1152], index: 8, kind: output, shape index: {0}]   ;;  %s1207_s9 = inlined_call_operand.hbm [shape: f32[8,128], index: 9, kind: output, shape index: {1}]   ;;  %s1208_s10 = inlined_call_operand.hbm [shape: f32[2,128], index: 10, kind: output, shape index: {2}]  }
   0x1   :  { %17 = vsyncpa [#allocation6], 0 }
   0x2   :  { %18 = vsyncpa [#allocation4], 0 }
   0x3   :  { %19 = vsyncpa [#allocation9], 0  ;;  %s30_s15 = sshll.u32 %s1201_s3, 4  ;;  %s1020_s16 = smov [#allocation2]   ;;  %s31_s15 = int_to_ptr.hbm [resolvable:$true] %s30_s15 }
   0x4   :  { %s32_s17 = sshll.u32 %s1020_s16, 4  ;;  %s47_s20 = sshll.u32 %s1204_s6, 4  ;;  %s33_s17 = int_to_ptr.vmem [resolvable:$true] %s32_s17  ;;  %s48_s20 = int_to_ptr.hbm [resolvable:$true] %s47_s20 }
   0x5   :  { %s1021_s21 = smov 128   ;;  %s1022_s22 = smov 8  }
   0x6   :  { %38 = dma.hbm_to_vmem [thread:$0]  %s31_s15, 18432, %s33_s17, [#allocation3], %s1021_s21, %s1021_s21, %s1022_s22  }
   0x7   :  { %s1023_s23 = smov [#allocation5]  }
   0x8   :  { %s49_s24 = sshll.u32 %s1023_s23, 4  ;;  %s50_s24 = int_to_ptr.vmem [resolvable:$true] %s49_s24 }
   0x9   :  { %55 = dma.hbm_to_vmem [thread:$0]  %s48_s20, 12288, %s50_s24, [#allocation6], %s1021_s21, %s1021_s21, %s1022_s22  }
   0xa   :  { %1012 = dma.done.wait [#allocation3], 18432  }
   0xb   :  { %1013 = vsyncadd [#allocation3], 4294948864 }
   0xc   :  { %1014 = dma.done.wait [#allocation6], 12288  }
   0xd   :  { %1015 = vsyncadd [#allocation6], 4294955008  ;;  %vm98_vm0 = vcmask 64512   ;;  %v67_v0 = vld [vmem:[%s1199_s1] sm:$0xff]  ;;  %v68_v2 = vld [vmem:[%s1199_s1 + $0x8] sm:$0xff]  ;;  %s1024_s22 = smov [#allocation7]  }
   0xe   :  { %v1093_v1 = vld [vmem:[%s1198_s0] sm:$0xff]  ;;  %117 = vmatpush.msra.mxu0 %v67_v0  ;;  %v69_v3 = vld [vmem:[%s1199_s1 + $0x10] sm:$0xff]  ;;  %v70_v4 = vld [vmem:[%s1199_s1 + $0x18] sm:$0xff]  ;;  %s867_s23 = sshll.u32 %s1024_s22, 4  ;;  %s869_s3 = sshll.u32 %s1207_s9, 4  ;;  %s868_s23 = int_to_ptr.vmem [resolvable:$true] %s867_s23  ;;  %s870_s3 = int_to_ptr.hbm [resolvable:$true] %s869_s3 }
   0xf   :  { %v73_v5 = vld [vmem:[%s1199_s1 + $0x30] sm:$0xff]  ;;  %898 = vmatmul.msk.f32.vlgmr.msra.gmra.mxu0 %vm98_vm0, %v1093_v1  ;;  %177 = vmatpush.msra.mxu3 %v70_v4  ;;  %v72_v6 = vld [vmem:[%s1199_s1 + $0x28] sm:$0xff]  ;;  %v74_v7 = vld [vmem:[%s1199_s1 + $0x38] sm:$0xff]  ;;  %s1025_s9 = smov [#allocation8]   ;;  %s880_s29 = sshll.u32 %s1208_s10, 4  ;;  %s881_s29 = int_to_ptr.hbm [resolvable:$true] %s880_s29 }
  0x10   :  { %137 = vmatpush.msrb.mxu0 %v68_v2  ;;  %237 = vmatpush.msra.mxu2 %v73_v5  ;;  %v306_v8 = vld [vmem:[#allocation2 + $0x78] sm:$0xff]  ;;  %v305_v10 = vld [vmem:[#allocation2 + $0x70] sm:$0xff]  ;;  %v304_v15 = vld [vmem:[#allocation2 + $0x68] sm:$0xff]  ;;  %s878_s27 = sshll.u32 %s1025_s9, 4  ;;  %s879_s27 = int_to_ptr.vmem [resolvable:$true] %s878_s27 }
  0x11   :  { %901 = vmatmul.msk.f32.vlgmr.msra.gmra.mxu3 %vm98_vm0, %v1093_v1  ;;  %904 = vmatmul.msk.f32.vlgmr.msra.gmra.mxu2 %vm98_vm0, %v1093_v1  ;;  %v322_v9 = vld [vmem:[#allocation2 + $0xf8] sm:$0xff]  ;;  %v321_v11 = vld [vmem:[#allocation2 + $0xf0] sm:$0xff]  ;;  %v320_v16 = vld [vmem:[#allocation2 + $0xe8] sm:$0xff] }
  0x12   :  { %157 = vmatpush.msra.mxu0 %v69_v3  ;;  %217 = vmatpush.msra.mxu1 %v72_v6  ;;  %v338_v12 = vld [vmem:[#allocation2 + $0x178] sm:$0xff]  ;;  %v337_v13 = vld [vmem:[#allocation2 + $0x170] sm:$0xff]  ;;  %v303_v17 = vld [vmem:[#allocation2 + $0x60] sm:$0xff] }
  0x13   :  { %903 = vmatmul.msk.f32.vlgmr.msra.gmra.mxu1 %vm98_vm0, %v1093_v1  ;;  %257 = vmatpush.msrb.mxu3 %v74_v7  ;;  %v71_v14 = vld [vmem:[%s1199_s1 + $0x20] sm:$0xff]  ;;  %v336_v18 = vld [vmem:[#allocation2 + $0x168] sm:$0xff]  ;;  %v319_v19 = vld [vmem:[#allocation2 + $0xe0] sm:$0xff] }
  0x14   :  { %439 = vmatpush.msrb.mxu1 %v306_v8  ;;  %459 = vmatpush.msrb.mxu2 %v322_v9  ;;  %v302_v20 = vld [vmem:[#allocation2 + $0x58] sm:$0xff]  ;;  %v335_v21 = vld [vmem:[#allocation2 + $0x160] sm:$0xff]  ;;  %v301_v23 = vld [vmem:[#allocation2 + $0x50] sm:$0xff] }
  0x15   :  { %479 = vmatpush.msra.mxu3 %v338_v12  ;;  %v318_v22 = vld [vmem:[#allocation2 + $0xd8] sm:$0xff]  ;;  %v317_v25 = vld [vmem:[#allocation2 + $0xd0] sm:$0xff]  ;;  %v300_v27 = vld [vmem:[#allocation2 + $0x48] sm:$0xff] }
  0x16   :  { %440 = vmatpush.msrb.mxu1 %v305_v10  ;;  %460 = vmatpush.msrb.mxu2 %v321_v11  ;;  %v334_v24 = vld [vmem:[#allocation2 + $0x158] sm:$0xff]  ;;  %v316_v28 = vld [vmem:[#allocation2 + $0xc8] sm:$0xff]  ;;  %v333_v29 = vld [vmem:[#allocation2 + $0x150] sm:$0xff] }
  0x17   :  { %899 = vmatmul.msk.f32.vlgmr.msrb.gmra.mxu0 %vm98_vm0, %v1093_v1  ;;  %480 = vmatpush.msra.mxu3 %v337_v13  ;;  %v75_v26 = vld [vmem:[%s1199_s1 + $0x40] sm:$0xff]  ;;  %v299_v30 = vld [vmem:[#allocation2 + $0x40] sm:$0xff]  ;;  %v332_v32 = vld [vmem:[#allocation2 + $0x148] sm:$0xff] }
  0x18   :  { %197 = vmatpush.msrb.mxu0 %v71_v14  ;;  %441 = vmatpush.msrb.mxu1 %v304_v15  ;;  %v315_v31 = vld [vmem:[#allocation2 + $0xc0] sm:$0xff]  ;;  %v298_v33 = vld [vmem:[#allocation2 + $0x38] sm:$0xff]  ;;  %v297_v36 = vld [vmem:[#allocation2 + $0x30] sm:$0xff] }
  0x19   :  { %905 = vmatmul.msk.f32.vlgmr.msrb.gmra.mxu3 %vm98_vm0, %v1093_v1  ;;  %461 = vmatpush.msrb.mxu2 %v320_v16  ;;  %v314_v34 = vld [vmem:[#allocation2 + $0xb8] sm:$0xff]  ;;  %v331_v35 = vld [vmem:[#allocation2 + $0x140] sm:$0xff]  ;;  %v313_v37 = vld [vmem:[#allocation2 + $0xb0] sm:$0xff] }
  0x1a   :  { %442 = vmatpush.msrb.mxu1 %v303_v17  ;;  %481 = vmatpush.msra.mxu3 %v336_v18  ;;  %v296_v38 = vld [vmem:[#allocation2 + $0x28] sm:$0xff]  ;;  %v330_v39 = vld [vmem:[#allocation2 + $0x138] sm:$0xff]  ;;  %v295_v42 = vld [vmem:[#allocation2 + $0x20] sm:$0xff] }
  0x1b   :  { %462 = vmatpush.msrb.mxu2 %v319_v19  ;;  %v354_v40 = vld [vmem:[#allocation2 + $0x1f8] sm:$0xff]  ;;  %v312_v41 = vld [vmem:[#allocation2 + $0xa8] sm:$0xff]  ;;  %v329_v43 = vld [vmem:[#allocation2 + $0x130] sm:$0xff] }
  0x1c   :  { %443 = vmatpush.msrb.mxu1 %v302_v20  ;;  %482 = vmatpush.msra.mxu3 %v335_v21  ;;  %v353_v44 = vld [vmem:[#allocation2 + $0x1f0] sm:$0xff]  ;;  %v311_v45 = vld [vmem:[#allocation2 + $0xa0] sm:$0xff]  ;;  %v294_v46 = vld [vmem:[#allocation2 + $0x18] sm:$0xff] }
  0x1d   :  { %463 = vmatpush.msrb.mxu2 %v318_v22  ;;  %v328_v47 = vld [vmem:[#allocation2 + $0x128] sm:$0xff]  ;;  %v310_v49 = vld [vmem:[#allocation2 + $0x98] sm:$0xff]  ;;  %v293_v50 = vld [vmem:[#allocation2 + $0x10] sm:$0xff] }
  0x1e   :  { %444 = vmatpush.msrb.mxu1 %v301_v23  ;;  %483 = vmatpush.msra.mxu3 %v334_v24  ;;  %v352_v48 = vld [vmem:[#allocation2 + $0x1e8] sm:$0xff]  ;;  %v327_v51 = vld [vmem:[#allocation2 + $0x120] sm:$0xff]  ;;  %v309_v52 = vld [vmem:[#allocation2 + $0x90] sm:$0xff] }
  0x1f   :  { %900 = vmatmul.msk.f32.vlgmr.msra.gmra.mxu0 %vm98_vm0, %v1093_v1  ;;  %464 = vmatpush.msrb.mxu2 %v317_v25  ;;  %v292_v53 = vld [vmem:[#allocation2 + $0x8] sm:$0xff]  ;;  %v351_v54 = vld [vmem:[#allocation2 + $0x1e0] sm:$0xff]  ;;  %v326_v55 = vld [vmem:[#allocation2 + $0x118] sm:$0xff] }
  0x20   :  { %277 = vmatpush.msra.mxu0 %v75_v26  ;;  %445 = vmatpush.msrb.mxu1 %v300_v27  ;;  %v308_v56 = vld [vmem:[#allocation2 + $0x88] sm:$0xff]  ;;  %v291_v57 = vld [vmem:[#allocation2] sm:$0xff]  ;;  %v350_v58 = vld [vmem:[#allocation2 + $0x1d8] sm:$0xff] }
  0x21   :  { %465 = vmatpush.msrb.mxu2 %v316_v28  ;;  %484 = vmatpush.msra.mxu3 %v333_v29  ;;  %v370_v59 = vld [vmem:[#allocation2 + $0x278] sm:$0xff]  ;;  %v325_v60 = vld [vmem:[#allocation2 + $0x110] sm:$0xff]  ;;  %v307_v62 = vld [vmem:[#allocation2 + $0x80] sm:$0xff] }
  0x22   :  { %446 = vmatpush.msrb.mxu1 %v299_v30  ;;  %v349_v61 = vld [vmem:[#allocation2 + $0x1d0] sm:$0xff]  ;;  %v324_v0 = vld [vmem:[#allocation2 + $0x108] sm:$0xff]  ;;  %v386_v3 = vld [vmem:[#allocation2 + $0x2f8] sm:$0xff] }
  0x23   :  { %466 = vmatpush.msrb.mxu2 %v315_v31  ;;  %485 = vmatpush.msra.mxu3 %v332_v32  ;;  %v369_v63 = vld [vmem:[#allocation2 + $0x270] sm:$0xff]  ;;  %v348_v2 = vld [vmem:[#allocation2 + $0x1c8] sm:$0xff]  ;;  %v323_v4 = vld [vmem:[#allocation2 + $0x100] sm:$0xff] }
  0x24   :  { %447 = vmatpush.msrb.mxu1 %v298_v33  ;;  %v347_v5 = vld [vmem:[#allocation2 + $0x1c0] sm:$0xff]  ;;  %v385_v6 = vld [vmem:[#allocation2 + $0x2f0] sm:$0xff]  ;;  %v402_v8 = vld [vmem:[#allocation2 + $0x378] sm:$0xff] }
  0x25   :  { %467 = vmatpush.msrb.mxu2 %v314_v34  ;;  %486 = vmatpush.msra.mxu3 %v331_v35  ;;  %v367_v7 = vld [vmem:[#allocation2 + $0x260] sm:$0xff]  ;;  %v346_v9 = vld [vmem:[#allocation2 + $0x1b8] sm:$0xff]  ;;  %v384_v10 = vld [vmem:[#allocation2 + $0x2e8] sm:$0xff] }
  0x26   :  { %448 = vmatpush.msrb.mxu1 %v297_v36  ;;  %v366_v11 = vld [vmem:[#allocation2 + $0x258] sm:$0xff]  ;;  %v401_v12 = vld [vmem:[#allocation2 + $0x370] sm:$0xff]  ;;  %v383_v14 = vld [vmem:[#allocation2 + $0x2e0] sm:$0xff] }
  0x27   :  { %902 = vmatmul.msk.f32.vlgmr.msrb.gmra.mxu0 %vm98_vm0, %v1093_v1  ;;  %468 = vmatpush.msrb.mxu2 %v313_v37  ;;  %v345_v13 = vld [vmem:[#allocation2 + $0x1b0] sm:$0xff]  ;;  %v400_v16 = vld [vmem:[#allocation2 + $0x368] sm:$0xff]  ;;  %v382_v18 = vld [vmem:[#allocation2 + $0x2d8] sm:$0xff] }
  0x28   :  { %449 = vmatpush.msrb.mxu1 %v296_v38  ;;  %487 = vmatpush.msra.mxu3 %v330_v39  ;;  %v365_v15 = vld [vmem:[#allocation2 + $0x250] sm:$0xff]  ;;  %v344_v17 = vld [vmem:[#allocation2 + $0x1a8] sm:$0xff]  ;;  %v399_v20 = vld [vmem:[#allocation2 + $0x360] sm:$0xff] }
  0x29   :  { %499 = vmatpush.msrb.mxu0 %v354_v40  ;;  %469 = vmatpush.msrb.mxu2 %v312_v41  ;;  %v364_v19 = vld [vmem:[#allocation2 + $0x248] sm:$0xff]  ;;  %v343_v21 = vld [vmem:[#allocation2 + $0x1a0] sm:$0xff]  ;;  %v381_v22 = vld [vmem:[#allocation2 + $0x2d0] sm:$0xff] }
  0x2a   :  { %450 = vmatpush.msrb.mxu1 %v295_v42  ;;  %488 = vmatpush.msra.mxu3 %v329_v43  ;;  %v363_v23 = vld [vmem:[#allocation2 + $0x240] sm:$0xff]  ;;  %v398_v24 = vld [vmem:[#allocation2 + $0x358] sm:$0xff]  ;;  %v380_v26 = vld [vmem:[#allocation2 + $0x2c8] sm:$0xff] }
  0x2b   :  { %500 = vmatpush.msrb.mxu0 %v353_v44  ;;  %470 = vmatpush.msrb.mxu2 %v311_v45  ;;  %v342_v25 = vld [vmem:[#allocation2 + $0x198] sm:$0xff]  ;;  %v397_v28 = vld [vmem:[#allocation2 + $0x350] sm:$0xff]  ;;  %v360_v31 = vld [vmem:[#allocation2 + $0x228] sm:$0xff] }
  0x2c   :  { %451 = vmatpush.msrb.mxu1 %v294_v46  ;;  %489 = vmatpush.msra.mxu3 %v328_v47  ;;  %v362_v27 = vld [vmem:[#allocation2 + $0x238] sm:$0xff]  ;;  %v341_v29 = vld [vmem:[#allocation2 + $0x190] sm:$0xff]  ;;  %v359_v32 = vld [vmem:[#allocation2 + $0x220] sm:$0xff] }
  0x2d   :  { %501 = vmatpush.msrb.mxu0 %v352_v48  ;;  %471 = vmatpush.msrb.mxu2 %v310_v49  ;;  %v361_v30 = vld [vmem:[#allocation2 + $0x230] sm:$0xff]  ;;  %v358_v33 = vld [vmem:[#allocation2 + $0x218] sm:$0xff]  ;;  %v379_v34 = vld [vmem:[#allocation2 + $0x2c0] sm:$0xff] }
  0x2e   :  { %452 = vmatpush.msrb.mxu1 %v293_v50  ;;  %490 = vmatpush.msra.mxu3 %v327_v51  ;;  %v396_v35 = vld [vmem:[#allocation2 + $0x348] sm:$0xff]  ;;  %v357_v37 = vld [vmem:[#allocation2 + $0x210] sm:$0xff]  ;;  %v378_v38 = vld [vmem:[#allocation2 + $0x2b8] sm:$0xff] }
  0x2f   :  { %906 = vmatmul.msk.f32.vlgmr.msra.gmra.mxu0 %vm98_vm0, %v1093_v1  ;;  %472 = vmatpush.msrb.mxu2 %v309_v52  ;;  %v368_v1 = vld [vmem:[#allocation2 + $0x268] sm:$0xff]  ;;  %v395_v39 = vld [vmem:[#allocation2 + $0x340] sm:$0xff]  ;;  %v377_v42 = vld [vmem:[#allocation2 + $0x2b0] sm:$0xff] }
  0x30   :  { %453 = vmatpush.msrb.mxu1 %v292_v53  ;;  %502 = vmatpush.msrb.mxu0 %v351_v54  ;;  %v340_v36 = vld [vmem:[#allocation2 + $0x188] sm:$0xff]  ;;  %v339_v40 = vld [vmem:[#allocation2 + $0x180] sm:$0xff]  ;;  %v394_v43 = vld [vmem:[#allocation2 + $0x338] sm:$0xff] }
  0x31   :  { %491 = vmatpush.msra.mxu3 %v326_v55  ;;  %473 = vmatpush.msrb.mxu2 %v308_v56  ;;  %v356_v41 = vld [vmem:[#allocation2 + $0x208] sm:$0xff]  ;;  %v418_v44 = vld [vmem:[#allocation2 + $0x3f8] sm:$0xff]  ;;  %v355_v45 = vld [vmem:[#allocation2 + $0x200] sm:$0xff] }
  0x32   :  { %454 = vmatpush.msrb.mxu1 %v291_v57  ;;  %503 = vmatpush.msrb.mxu0 %v350_v58  ;;  %v376_v46 = vld [vmem:[#allocation2 + $0x2a8] sm:$0xff]  ;;  %v393_v47 = vld [vmem:[#allocation2 + $0x330] sm:$0xff]  ;;  %v375_v49 = vld [vmem:[#allocation2 + $0x2a0] sm:$0xff] }
  0x33   :  { %492 = vmatpush.msra.mxu3 %v325_v60  ;;  %474 = vmatpush.msrb.mxu2 %v307_v62  ;;  %v417_v48 = vld [vmem:[#allocation2 + $0x3f0] sm:$0xff]  ;;  %v392_v50 = vld [vmem:[#allocation2 + $0x328] sm:$0xff]  ;;  %v374_v52 = vld [vmem:[#allocation2 + $0x298] sm:$0xff] }
  0x34   :  { %519 = vmatpush.msra.mxu1 %v370_v59  ;;  %504 = vmatpush.msrb.mxu0 %v349_v61  ;;  %v416_v51 = vld [vmem:[#allocation2 + $0x3e8] sm:$0xff]  ;;  %v391_v53 = vld [vmem:[#allocation2 + $0x320] sm:$0xff]  ;;  %v373_v55 = vld [vmem:[#allocation2 + $0x290] sm:$0xff] }
  0x35   :  { %493 = vmatpush.msra.mxu3 %v324_v0  ;;  %539 = vmatpush.msra.mxu2 %v386_v3  ;;  %v415_v54 = vld [vmem:[#allocation2 + $0x3e0] sm:$0xff]  ;;  %v390_v56 = vld [vmem:[#allocation2 + $0x318] sm:$0xff]  ;;  %v372_v58 = vld [vmem:[#allocation2 + $0x288] sm:$0xff] }
  0x36   :  { %520 = vmatpush.msra.mxu1 %v369_v63  ;;  %505 = vmatpush.msrb.mxu0 %v348_v2  ;;  %v414_v57 = vld [vmem:[#allocation2 + $0x3d8] sm:$0xff]  ;;  %v389_v59 = vld [vmem:[#allocation2 + $0x310] sm:$0xff]  ;;  %v371_v61 = vld [vmem:[#allocation2 + $0x280] sm:$0xff] }
  0x37   :  { %494 = vmatpush.msra.mxu3 %v323_v4  ;;  %540 = vmatpush.msra.mxu2 %v385_v6  ;;  %v413_v60 = vld [vmem:[#allocation2 + $0x3d0] sm:$0xff]  ;;  %v388_v62 = vld [vmem:[#allocation2 + $0x308] sm:$0xff]  ;;  %v387_v0 = vld [vmem:[#allocation2 + $0x300] sm:$0xff] }
  0x38   :  { %521 = vmatpush.msra.mxu1 %v368_v1  ;;  %506 = vmatpush.msrb.mxu0 %v347_v5  ;;  %v412_v63 = vld [vmem:[#allocation2 + $0x3c8] sm:$0xff]  ;;  %v411_v2 = vld [vmem:[#allocation2 + $0x3c0] sm:$0xff]  ;;  %v410_v3 = vld [vmem:[#allocation2 + $0x3b8] sm:$0xff] }
  0x39   :  { %559 = vmatpush.msrb.mxu3 %v402_v8  ;;  %541 = vmatpush.msra.mxu2 %v384_v10  ;;  %v409_v1 = vld [vmem:[#allocation2 + $0x3b0] sm:$0xff]  ;;  %v408_v4 = vld [vmem:[#allocation2 + $0x3a8] sm:$0xff]  ;;  %v1140_v5 = vld [vmem:[%s1200_s2] sm:$0xff] }
  0x3a   :  { %522 = vmatpush.msra.mxu1 %v367_v7  ;;  %507 = vmatpush.msrb.mxu0 %v346_v9  ;;  %v407_v6 = vld [vmem:[#allocation2 + $0x3a0] sm:$0xff]  ;;  %v406_v7 = vld [vmem:[#allocation2 + $0x398] sm:$0xff]  ;;  %v80_v8 = vperm.slane %v1140_v5, 0  ;;  %v405_v9 = vld [vmem:[#allocation2 + $0x390] sm:$0xff] }
  0x3b   :  { %560 = vmatpush.msrb.mxu3 %v401_v12  ;;  %542 = vmatpush.msra.mxu2 %v383_v14  ;;  %v85_v14 = vperm.slane %v1140_v5, 5 }
  0x3c   :  { %523 = vmatpush.msra.mxu1 %v366_v11  ;;  %508 = vmatpush.msrb.mxu0 %v345_v13  ;;  %v404_v11 = vld [vmem:[#allocation2 + $0x388] sm:$0xff]  ;;  %v434_v13 = vld [vmem:[#allocation2 + $0x478] sm:$0xff] }
  0x3d   :  { %561 = vmatpush.msrb.mxu3 %v400_v16  ;;  %543 = vmatpush.msra.mxu2 %v382_v18  ;;  %v433_v16 = vld [vmem:[#allocation2 + $0x470] sm:$0xff]  ;;  %v81_v18 = vperm.slane %v1140_v5, 1 }
  0x3e   :  { %524 = vmatpush.msra.mxu1 %v365_v15  ;;  %509 = vmatpush.msrb.mxu0 %v344_v17  ;;  %v403_v15 = vld [vmem:[#allocation2 + $0x380] sm:$0xff] }
  0x3f   :  { %562 = vmatpush.msrb.mxu3 %v399_v20  ;;  %544 = vmatpush.msra.mxu2 %v381_v22  ;;  %v431_v22 = vld [vmem:[#allocation2 + $0x460] sm:$0xff] }
  0x40   :  { %525 = vmatpush.msra.mxu1 %v364_v19  ;;  %510 = vmatpush.msrb.mxu0 %v343_v21  ;;  %v432_v19 = vld [vmem:[#allocation2 + $0x468] sm:$0xff]  ;;  %v83_v21 = vperm.slane %v1140_v5, 3 }
  0x41   :  { %563 = vmatpush.msrb.mxu3 %v398_v24  ;;  %545 = vmatpush.msra.mxu2 %v380_v26 }
  0x42   :  { %526 = vmatpush.msra.mxu1 %v363_v23  ;;  %511 = vmatpush.msrb.mxu0 %v342_v25  ;;  %v86_v23 = vperm.slane %v1140_v5, 6 }
  0x43   :  { %564 = vmatpush.msrb.mxu3 %v397_v28  ;;  %546 = vmatpush.msra.mxu2 %v379_v34  ;;  %v637_v28 = vld [vmem:[#allocation5 + $0x78] sm:$0xff]  ;;  %v82_v34 = vperm.slane %v1140_v5, 2 }
  0x44   :  { %527 = vmatpush.msra.mxu1 %v362_v27  ;;  %512 = vmatpush.msrb.mxu0 %v341_v29  ;;  %v430_v27 = vld [vmem:[#allocation2 + $0x458] sm:$0xff] }
  0x45   :  { %565 = vmatpush.msrb.mxu3 %v396_v35  ;;  %547 = vmatpush.msra.mxu2 %v378_v38  ;;  %v428_v35 = vld [vmem:[#allocation2 + $0x448] sm:$0xff]  ;;  %v427_v38 = vld [vmem:[#allocation2 + $0x440] sm:$0xff] }
  0x46   :  { %528 = vmatpush.msra.mxu1 %v361_v30  ;;  %513 = vmatpush.msrb.mxu0 %v340_v36  ;;  %v635_v36 = vld [vmem:[#allocation5 + $0x68] sm:$0xff] }
  0x47   :  { %566 = vmatpush.msrb.mxu3 %v395_v39  ;;  %548 = vmatpush.msra.mxu2 %v377_v42  ;;  %v634_v39 = vld [vmem:[#allocation5 + $0x60] sm:$0xff] }
  0x48   :  { %529 = vmatpush.msra.mxu1 %v360_v31  ;;  %514 = vmatpush.msrb.mxu0 %v339_v40  ;;  %v429_v31 = vld [vmem:[#allocation2 + $0x450] sm:$0xff] }
  0x49   :  { %567 = vmatpush.msrb.mxu3 %v394_v43  ;;  %549 = vmatpush.msra.mxu2 %v376_v46  ;;  %v653_v43 = vld [vmem:[#allocation5 + $0xf8] sm:$0xff] }
  0x4a   :  { %530 = vmatpush.msra.mxu1 %v359_v32  ;;  %579 = vmatpush.msra.mxu0 %v418_v44  ;;  %v636_v32 = vld [vmem:[#allocation5 + $0x70] sm:$0xff]  ;;  %v426_v44 = vld [vmem:[#allocation2 + $0x438] sm:$0xff] }
  0x4b   :  { %568 = vmatpush.msrb.mxu3 %v393_v47  ;;  %550 = vmatpush.msra.mxu2 %v375_v49  ;;  %v633_v46 = vld [vmem:[#allocation5 + $0x58] sm:$0xff]  ;;  %v652_v47 = vld [vmem:[#allocation5 + $0xf0] sm:$0xff] }
  0x4c   :  { %531 = vmatpush.msra.mxu1 %v358_v33  ;;  %580 = vmatpush.msra.mxu0 %v417_v48  ;;  %v425_v48 = vld [vmem:[#allocation2 + $0x430] sm:$0xff] }
  0x4d   :  { %569 = vmatpush.msrb.mxu3 %v392_v50  ;;  %551 = vmatpush.msra.mxu2 %v374_v52  ;;  %v632_v49 = vld [vmem:[#allocation5 + $0x50] sm:$0xff]  ;;  %v669_v50 = vld [vmem:[#allocation5 + $0x178] sm:$0xff]  ;;  %v84_v52 = vperm.slane %v1140_v5, 4 }
  0x4e   :  { %532 = vmatpush.msra.mxu1 %v357_v37  ;;  %581 = vmatpush.msra.mxu0 %v416_v51  ;;  %v87_v37 = vperm.slane %v1140_v5, 7  ;;  %v651_v51 = vld [vmem:[#allocation5 + $0xe8] sm:$0xff]  ;;  %v913_v5 = vld [vmem:[%s1200_s2 + $0x8] ss:$0 sm:$0xff] }
  0x4f   :  { %570 = vmatpush.msrb.mxu3 %v391_v53  ;;  %552 = vmatpush.msra.mxu2 %v373_v55  ;;  %v424_v53 = vld [vmem:[#allocation2 + $0x428] sm:$0xff]  ;;  %v668_v55 = vld [vmem:[#allocation5 + $0x170] sm:$0xff] }
  0x50   :  { %533 = vmatpush.msra.mxu1 %v356_v41  ;;  %582 = vmatpush.msra.mxu0 %v415_v54  ;;  %v631_v54 = vld [vmem:[#allocation5 + $0x48] sm:$0xff] }
  0x51   :  { %571 = vmatpush.msrb.mxu3 %v390_v56  ;;  %553 = vmatpush.msra.mxu2 %v372_v58  ;;  %v650_v56 = vld [vmem:[#allocation5 + $0xe0] sm:$0xff] }
  0x52   :  { %534 = vmatpush.msra.mxu1 %v355_v45  ;;  %583 = vmatpush.msra.mxu0 %v414_v57  ;;  %v423_v57 = vld [vmem:[#allocation2 + $0x420] sm:$0xff] }
  0x53   :  { %572 = vmatpush.msrb.mxu3 %v389_v59  ;;  %554 = vmatpush.msra.mxu2 %v371_v61  ;;  %v422_v61 = vld [vmem:[#allocation2 + $0x418] sm:$0xff] }
  0x54   :  { %584 = vmatpush.msra.mxu0 %v413_v60  ;;  %v649_v60 = vld [vmem:[#allocation5 + $0xd8] sm:$0xff] }
  0x55   :  { %573 = vmatpush.msrb.mxu3 %v388_v62  ;;  %v630_v62 = vld [vmem:[#allocation5 + $0x40] sm:$0xff] }
  0x56   :  { %585 = vmatpush.msra.mxu0 %v412_v63  ;;  %v667_v63 = vld [vmem:[#allocation5 + $0x168] sm:$0xff] }
  0x57   :  { %574 = vmatpush.msrb.mxu3 %v387_v0  ;;  %v648_v0 = vld [vmem:[#allocation5 + $0xd0] sm:$0xff] }
  0x58   :  { %586 = vmatpush.msra.mxu0 %v411_v2  ;;  %v421_v2 = vld [vmem:[#allocation2 + $0x410] sm:$0xff] }
  0x5a   :  { %587 = vmatpush.msra.mxu0 %v410_v3  ;;  %v629_v3 = vld [vmem:[#allocation5 + $0x38] sm:$0xff] }
  0x5c   :  { %588 = vmatpush.msra.mxu0 %v409_v1  ;;  %v666_v1 = vld [vmem:[#allocation5 + $0x160] sm:$0xff] }
  0x5e   :  { %589 = vmatpush.msra.mxu0 %v408_v4  ;;  %v647_v4 = vld [vmem:[#allocation5 + $0xc8] sm:$0xff] }
  0x60   :  { %590 = vmatpush.msra.mxu0 %v407_v6  ;;  %v420_v6 = vld [vmem:[#allocation2 + $0x408] sm:$0xff] }
  0x62   :  { %591 = vmatpush.msra.mxu0 %v406_v7  ;;  %v628_v7 = vld [vmem:[#allocation5 + $0x30] sm:$0xff] }
  0x64   :  { %592 = vmatpush.msra.mxu0 %v405_v9  ;;  %v646_v9 = vld [vmem:[#allocation5 + $0xc0] sm:$0xff] }
  0x66   :  { %593 = vmatpush.msra.mxu0 %v404_v11 }
  0x68   :  { %594 = vmatpush.msra.mxu0 %v403_v15  ;;  %v645_v15 = vld [vmem:[#allocation5 + $0xb8] sm:$0xff] }
  0x8c   :  { %v119_v10 = vpop.f32.mrf.mxu0 }
  0x8d   :  { %v120_v12 = vadd.f32 %v119_v10, %v80_v8  ;;  %v665_v8 = vld [vmem:[#allocation5 + $0x158] sm:$0xff]  ;;  %v419_v10 = vld [vmem:[#allocation2 + $0x400] sm:$0xff] }
  0x8f   :  { %282 = vst [vmem:[%s1206_s8] sm:$0xff] %v120_v12  ;;  %455 = vmatmul.f32.vlgmr.msrb.gmra.mxu1 %v120_v12  ;;  %v627_v12 = vld [vmem:[#allocation5 + $0x28] sm:$0xff] }
  0x90   :  { %599 = vmatpush.msrb.mxu1 %v434_v13  ;;  %v219_v17 = vpop.f32.mrf.mxu1  ;;  %v620_v13 = vld [vmem:[%s1203_s5] sm:$0xff] }
  0x91   :  { %v220_v20 = vadd.f32 %v219_v17, %v85_v14  ;;  %724 = vst [vmem:[#allocation1] ss:$4 sm:$0xff] %v620_v13  ;;  %v626_v17 = vld [vmem:[#allocation5 + $0x20] sm:$0xff]  ;;  %v709_v13 = vld [vmem:[#allocation5 + $0x2b8] sm:$0xff] }
  0x92   :  { %600 = vmatpush.msrb.mxu1 %v433_v16  ;;  %v685_v16 = vld [vmem:[#allocation5 + $0x1f8] sm:$0xff] }
  0x93   :  { %287 = vst [vmem:[%s1206_s8 + $0x28] sm:$0xff] %v220_v20 }
  0x94   :  { %v139_v24 = vpop.f32.mrf.mxu0  ;;  %601 = vmatpush.msrb.mxu1 %v432_v19  ;;  %v179_v25 = vpop.f32.mrf.mxu3  ;;  %v644_v19 = vld [vmem:[#allocation5 + $0xb0] sm:$0xff] }
  0x95   :  { %v140_v26 = vadd.f32 %v139_v24, %v81_v18  ;;  %v180_v29 = vadd.f32 %v179_v25, %v83_v21  ;;  %v239_v30 = vpop.f32.mrf.mxu2  ;;  %v664_v18 = vld [vmem:[#allocation5 + $0x150] sm:$0xff]  ;;  %v625_v21 = vld [vmem:[#allocation5 + $0x18] sm:$0xff]  ;;  %v683_v24 = vld [vmem:[#allocation5 + $0x1e8] sm:$0xff] }
  0x96   :  { %602 = vmatpush.msrb.mxu1 %v431_v22  ;;  %v240_v33 = vadd.f32 %v239_v30, %v86_v23  ;;  %v663_v22 = vld [vmem:[#allocation5 + $0x148] sm:$0xff]  ;;  %v624_v25 = vld [vmem:[#allocation5 + $0x10] sm:$0xff]  ;;  %v661_v30 = vld [vmem:[#allocation5 + $0x138] sm:$0xff] }
  0x97   :  { %283 = vst [vmem:[%s1206_s8 + $0x8] sm:$0xff] %v140_v26  ;;  %475 = vmatmul.f32.vlgmr.msrb.gmra.mxu2 %v140_v26  ;;  %515 = vmatmul.f32.vlgmr.msrb.gmra.mxu0 %v180_v29  ;;  %v643_v23 = vld [vmem:[#allocation5 + $0xa8] sm:$0xff]  ;;  %v662_v26 = vld [vmem:[#allocation5 + $0x140] sm:$0xff] }
  0x98   :  { %603 = vmatpush.msrb.mxu1 %v430_v27  ;;  %739 = vmatpush.msrb.mxu2 %v637_v28  ;;  %285 = vst [vmem:[%s1206_s8 + $0x18] sm:$0xff] %v180_v29  ;;  %v642_v27 = vld [vmem:[#allocation5 + $0xa0] sm:$0xff]  ;;  %v623_v29 = vld [vmem:[#allocation5 + $0x8] sm:$0xff] }
  0x99   :  { %288 = vst [vmem:[%s1206_s8 + $0x30] sm:$0xff] %v240_v33  ;;  %779 = vmatpush.msrb.mxu0 %v669_v50  ;;  %v682_v28 = vld [vmem:[#allocation5 + $0x1e0] sm:$0xff]  ;;  %v716_v50 = vld [vmem:[#allocation5 + $0x2f0] sm:$0xff] }
  0x9a   :  { %604 = vmatpush.msrb.mxu1 %v429_v31  ;;  %740 = vmatpush.msrb.mxu2 %v636_v32  ;;  %v621_v31 = vld [vmem:[%s1203_s5 + $0x8] sm:$0xf]  ;;  %v641_v32 = vld [vmem:[#allocation5 + $0x98] sm:$0xff] }
  0x9b   :  { %780 = vmatpush.msrb.mxu0 %v668_v55  ;;  %726 = vst [vmem:[#allocation1 + $0x20] ss:$4 sm:$0xff] %v621_v31  ;;  %v676_v55 = vld [vmem:[#allocation5 + $0x1b0] sm:$0xff] }
  0x9c   :  { %v159_v40 = vpop.f32.mrf.mxu0  ;;  %605 = vmatpush.msrb.mxu1 %v428_v35  ;;  %741 = vmatpush.msrb.mxu2 %v635_v36  ;;  %v259_v41 = vpop.f32.mrf.mxu3  ;;  %v660_v35 = vld [vmem:[#allocation5 + $0x130] sm:$0xff] }
  0x9d   :  { %v160_v42 = vadd.f32 %v159_v40, %v82_v34  ;;  %v260_v45 = vadd.f32 %v259_v41, %v87_v37  ;;  %781 = vmatpush.msrb.mxu0 %v667_v63  ;;  %v622_v34 = vld [vmem:[#allocation5] sm:$0xff]  ;;  %v640_v36 = vld [vmem:[#allocation5 + $0x90] sm:$0xff]  ;;  %v701_v37 = vld [vmem:[#allocation5 + $0x278] sm:$0xff] }
  0x9e   :  { %606 = vmatpush.msrb.mxu1 %v427_v38  ;;  %742 = vmatpush.msrb.mxu2 %v634_v39  ;;  %v680_v38 = vld [vmem:[#allocation5 + $0x1d0] sm:$0xff]  ;;  %v659_v39 = vld [vmem:[#allocation5 + $0x128] sm:$0xff]  ;;  %v674_v63 = vld [vmem:[#allocation5 + $0x1a0] sm:$0xff] }
  0x9f   :  { %284 = vst [vmem:[%s1206_s8 + $0x10] sm:$0xff] %v160_v42  ;;  %495 = vmatmul.f32.vlgmr.msra.gmra.mxu3 %v160_v42  ;;  %555 = vmatmul.f32.vlgmr.msra.gmra.mxu2 %v220_v20  ;;  %v684_v20 = vld [vmem:[#allocation5 + $0x1f0] sm:$0xff]  ;;  %v639_v40 = vld [vmem:[#allocation5 + $0x88] sm:$0xff] }
  0xa0   :  { %759 = vmatpush.msra.mxu3 %v653_v43  ;;  %607 = vmatpush.msrb.mxu1 %v426_v44  ;;  %289 = vst [vmem:[%s1206_s8 + $0x38] sm:$0xff] %v260_v45  ;;  %v700_v41 = vld [vmem:[#allocation5 + $0x270] sm:$0xff]  ;;  %v679_v42 = vld [vmem:[#allocation5 + $0x1c8] sm:$0xff]  ;;  %v727_v43 = vld.sshfl [vmem:[#allocation1] sm:$0xff pattern:$0x73625140] }
  0xa1   :  { %743 = vmatpush.msrb.mxu2 %v633_v46  ;;  %595 = vmatmul.f32.vlgmr.msra.gmra.mxu0 %v260_v45  ;;  %v638_v44 = vld [vmem:[#allocation5 + $0x80] sm:$0xff]  ;;  %v699_v45 = vld [vmem:[#allocation5 + $0x268] sm:$0xff]  ;;  %v717_v46 = vld [vmem:[#allocation5 + $0x2f8] sm:$0xff] }
  0xa2   :  { %760 = vmatpush.msra.mxu3 %v652_v47  ;;  %608 = vmatpush.msrb.mxu1 %v425_v48  ;;  %v678_v47 = vld [vmem:[#allocation5 + $0x1c0] sm:$0xff] }
  0xa3   :  { %744 = vmatpush.msrb.mxu2 %v632_v49  ;;  %782 = vmatpush.msrb.mxu0 %v666_v1  ;;  %v698_v48 = vld [vmem:[#allocation5 + $0x260] sm:$0xff]  ;;  %v673_v1 = vld [vmem:[#allocation5 + $0x198] sm:$0xff] }
  0xa4   :  { %761 = vmatpush.msra.mxu3 %v651_v51  ;;  %v199_v58 = vpop.f32.mrf.mxu0  ;;  %609 = vmatpush.msrb.mxu1 %v424_v53  ;;  %v658_v49 = vld [vmem:[#allocation5 + $0x120] sm:$0xff]  ;;  %v677_v51 = vld [vmem:[#allocation5 + $0x1b8] sm:$0xff] }
  0xa5   :  { %v200_v59 = vadd.f32 %v199_v58, %v84_v52  ;;  %745 = vmatpush.msrb.mxu2 %v631_v54  ;;  %783 = vmatpush.msrb.mxu0 %v665_v8  ;;  %v697_v52 = vld [vmem:[#allocation5 + $0x258] sm:$0xff]  ;;  %v728_v53 = vld.sshfl [vmem:[#allocation1 + $0x8] sm:$0xff pattern:$0x73625140]  ;;  %v715_v54 = vld [vmem:[#allocation5 + $0x2e8] sm:$0xff] }
  0xa6   :  { %762 = vmatpush.msra.mxu3 %v650_v56  ;;  %610 = vmatpush.msrb.mxu1 %v423_v57  ;;  %v696_v56 = vld [vmem:[#allocation5 + $0x250] sm:$0xff]  ;;  %v657_v57 = vld [vmem:[#allocation5 + $0x118] sm:$0xff]  ;;  %v714_v58 = vld [vmem:[#allocation5 + $0x2e0] sm:$0xff] }
  0xa7   :  { %286 = vst [vmem:[%s1206_s8 + $0x20] sm:$0xff] %v200_v59  ;;  %575 = vmatmul.f32.vlgmr.msrb.gmra.mxu3 %v240_v33  ;;  %535 = vmatmul.f32.vlgmr.msra.gmra.mxu1 %v200_v59  ;;  %v681_v33 = vld [vmem:[#allocation5 + $0x1d8] sm:$0xff]  ;;  %v675_v59 = vld [vmem:[#allocation5 + $0x1a8] sm:$0xff]  ;;  %v692_v8 = vld [vmem:[#allocation5 + $0x230] sm:$0xff] }
  0xa8   :  { %763 = vmatpush.msra.mxu3 %v649_v60  ;;  %611 = vmatpush.msrb.mxu1 %v422_v61  ;;  %v695_v60 = vld [vmem:[#allocation5 + $0x248] sm:$0xff]  ;;  %v656_v61 = vld [vmem:[#allocation5 + $0x110] sm:$0xff] }
  0xa9   :  { %746 = vmatpush.msrb.mxu2 %v630_v62  ;;  %784 = vmatpush.msrb.mxu0 %v664_v18  ;;  %v713_v62 = vld [vmem:[#allocation5 + $0x2d8] sm:$0xff] }
  0xaa   :  { %764 = vmatpush.msra.mxu3 %v648_v0  ;;  %612 = vmatpush.msrb.mxu1 %v421_v2  ;;  %v694_v0 = vld [vmem:[#allocation5 + $0x240] sm:$0xff]  ;;  %v655_v2 = vld [vmem:[#allocation5 + $0x108] sm:$0xff]  ;;  %v689_v18 = vld [vmem:[#allocation5 + $0x218] sm:$0xff] }
  0xab   :  { %747 = vmatpush.msrb.mxu2 %v629_v3  ;;  %785 = vmatpush.msrb.mxu0 %v663_v22  ;;  %v712_v3 = vld [vmem:[#allocation5 + $0x2d0] sm:$0xff]  ;;  %v687_v22 = vld [vmem:[#allocation5 + $0x208] sm:$0xff] }
  0xac   :  { %765 = vmatpush.msra.mxu3 %v647_v4  ;;  %v279_v11 = vpop.f32.mrf.mxu0  ;;  %613 = vmatpush.msrb.mxu1 %v420_v6  ;;  %v693_v4 = vld [vmem:[#allocation5 + $0x238] sm:$0xff]  ;;  %v711_v6 = vld [vmem:[#allocation5 + $0x2c8] sm:$0xff] }
  0xad   :  { %v280_v14 = vadd.f32 %v913_v5, %v279_v11  ;;  %748 = vmatpush.msrb.mxu2 %v628_v7  ;;  %786 = vmatpush.msrb.mxu0 %v662_v26  ;;  %v654_v5 = vld [vmem:[#allocation5 + $0x100] sm:$0xff]  ;;  %v672_v7 = vld [vmem:[#allocation5 + $0x190] sm:$0xff]  ;;  %v671_v11 = vld [vmem:[#allocation5 + $0x188] sm:$0xff] }
  0xae   :  { %766 = vmatpush.msra.mxu3 %v646_v9  ;;  %614 = vmatpush.msrb.mxu1 %v419_v10  ;;  %v729_v9 = vld.sshfl [vmem:[#allocation1 + $0x10] sm:$0xff pattern:$0x73625140]  ;;  %v710_v10 = vld [vmem:[#allocation5 + $0x2c0] sm:$0xff] }
  0xaf   :  { %290 = vst [vmem:[%s1206_s8 + $0x40] sm:$0xff] %v280_v14  ;;  %615 = vmatmul.f32.vlgmr.msrb.gmra.mxu1 %v280_v14  ;;  %749 = vmatpush.msrb.mxu2 %v627_v12  ;;  %v691_v12 = vld [vmem:[#allocation5 + $0x228] sm:$0xff]  ;;  %v670_v14 = vld [vmem:[#allocation5 + $0x180] sm:$0xff]  ;;  %v731_v26 = vld.sshfl [vmem:[#allocation1 + $0x20] sm:$0xff pattern:$0x73625140] }
  0xb0   :  { %767 = vmatpush.msra.mxu3 %v645_v15  ;;  %799 = vmatpush.msra.mxu1 %v685_v16  ;;  %v690_v15 = vld [vmem:[#allocation5 + $0x220] sm:$0xff]  ;;  %v730_v16 = vld.sshfl [vmem:[#allocation1 + $0x18] sm:$0xff pattern:$0x73625140] }
  0xb1   :  { %750 = vmatpush.msrb.mxu2 %v626_v17  ;;  %787 = vmatpush.msrb.mxu0 %v661_v30  ;;  %v708_v17 = vld [vmem:[#allocation5 + $0x2b0] sm:$0xff]  ;;  %v914_v30 = vld [vmem:[%s1202_s4] ss:$0 sm:$0xff] }
  0xb2   :  { %768 = vmatpush.msra.mxu3 %v644_v19  ;;  %800 = vmatpush.msra.mxu1 %v684_v20  ;;  %v707_v19 = vld [vmem:[#allocation5 + $0x2a8] sm:$0xff]  ;;  %v688_v20 = vld [vmem:[#allocation5 + $0x210] sm:$0xff] }
  0xb3   :  { %751 = vmatpush.msrb.mxu2 %v625_v21  ;;  %788 = vmatpush.msrb.mxu0 %v660_v35  ;;  %v706_v21 = vld [vmem:[#allocation5 + $0x2a0] sm:$0xff] }
  0xb4   :  { %769 = vmatpush.msra.mxu3 %v643_v23  ;;  %801 = vmatpush.msra.mxu1 %v683_v24  ;;  %v705_v23 = vld [vmem:[#allocation5 + $0x298] sm:$0xff]  ;;  %v686_v24 = vld [vmem:[#allocation5 + $0x200] sm:$0xff] }
  0xb5   :  { %752 = vmatpush.msrb.mxu2 %v624_v25  ;;  %789 = vmatpush.msrb.mxu0 %v659_v39  ;;  %v704_v25 = vld [vmem:[#allocation5 + $0x290] sm:$0xff] }
  0xb6   :  { %770 = vmatpush.msra.mxu3 %v642_v27  ;;  %802 = vmatpush.msra.mxu1 %v682_v28  ;;  %v703_v27 = vld [vmem:[#allocation5 + $0x288] sm:$0xff]  ;;  %v702_v28 = vld [vmem:[#allocation5 + $0x280] sm:$0xff] }
  0xb7   :  { %753 = vmatpush.msrb.mxu2 %v623_v29  ;;  %790 = vmatpush.msrb.mxu0 %v658_v49  ;;  %v732_v29 = vld.sshfl [vmem:[#allocation1 + $0x28] sm:$0xff pattern:$0x73625140]  ;;  %v915_v49 = vld [vmem:[%s1205_s7] ss:$0 sm:$0xff] }
  0xb8   :  { %771 = vmatpush.msra.mxu3 %v641_v32  ;;  %803 = vmatpush.msra.mxu1 %v681_v33 }
  0xb9   :  { %754 = vmatpush.msrb.mxu2 %v622_v34  ;;  %791 = vmatpush.msrb.mxu0 %v657_v57 }
  0xba   :  { %772 = vmatpush.msra.mxu3 %v640_v36  ;;  %804 = vmatpush.msra.mxu1 %v680_v38 }
  0xbb   :  { %819 = vmatpush.msra.mxu2 %v701_v37  ;;  %792 = vmatpush.msrb.mxu0 %v656_v61 }
  0xbc   :  { %773 = vmatpush.msra.mxu3 %v639_v40  ;;  %805 = vmatpush.msra.mxu1 %v679_v42 }
  0xbd   :  { %820 = vmatpush.msra.mxu2 %v700_v41  ;;  %793 = vmatpush.msrb.mxu0 %v655_v2 }
  0xbe   :  { %755 = vmatmul.f32.vlgmr.msrb.gmra.mxu2 %v727_v43  ;;  %774 = vmatpush.msra.mxu3 %v638_v44 }
  0xbf   :  { %821 = vmatpush.msra.mxu2 %v699_v45  ;;  %806 = vmatpush.msra.mxu1 %v678_v47 }
  0xc0   :  { %839 = vmatpush.msrb.mxu3 %v717_v46  ;;  %794 = vmatpush.msrb.mxu0 %v654_v5 }
  0xc1   :  { %822 = vmatpush.msra.mxu2 %v698_v48  ;;  %807 = vmatpush.msra.mxu1 %v677_v51 }
  0xc2   :  { %840 = vmatpush.msrb.mxu3 %v716_v50  ;;  %795 = vmatmul.f32.vlgmr.msrb.gmra.mxu0 %v729_v9 }
  0xc3   :  { %823 = vmatpush.msra.mxu2 %v697_v52  ;;  %775 = vmatmul.f32.vlgmr.msra.gmra.mxu3 %v728_v53 }
  0xc4   :  { %841 = vmatpush.msrb.mxu3 %v715_v54  ;;  %808 = vmatpush.msra.mxu1 %v676_v55 }
  0xc5   :  { %824 = vmatpush.msra.mxu2 %v696_v56 }
  0xc6   :  { %842 = vmatpush.msrb.mxu3 %v714_v58  ;;  %809 = vmatpush.msra.mxu1 %v675_v59 }
  0xc7   :  { %825 = vmatpush.msra.mxu2 %v695_v60 }
  0xc8   :  { %843 = vmatpush.msrb.mxu3 %v713_v62  ;;  %810 = vmatpush.msra.mxu1 %v674_v63 }
  0xc9   :  { %826 = vmatpush.msra.mxu2 %v694_v0 }
  0xca   :  { %844 = vmatpush.msrb.mxu3 %v712_v3  ;;  %811 = vmatpush.msra.mxu1 %v673_v1 }
  0xcb   :  { %827 = vmatpush.msra.mxu2 %v693_v4 }
  0xcc   :  { %845 = vmatpush.msrb.mxu3 %v711_v6  ;;  %812 = vmatpush.msra.mxu1 %v672_v7 }
  0xcd   :  { %828 = vmatpush.msra.mxu2 %v692_v8 }
  0xce   :  { %846 = vmatpush.msrb.mxu3 %v710_v10  ;;  %813 = vmatpush.msra.mxu1 %v671_v11 }
  0xcf   :  { %829 = vmatpush.msra.mxu2 %v691_v12 }
  0xd0   :  { %847 = vmatpush.msrb.mxu3 %v709_v13  ;;  %814 = vmatpush.msra.mxu1 %v670_v14 }
  0xd1   :  { %830 = vmatpush.msra.mxu2 %v690_v15  ;;  %815 = vmatmul.f32.vlgmr.msra.gmra.mxu1 %v730_v16 }
  0xd2   :  { %848 = vmatpush.msrb.mxu3 %v708_v17 }
  0xd3   :  { %831 = vmatpush.msra.mxu2 %v689_v18 }
  0xd4   :  { %849 = vmatpush.msrb.mxu3 %v707_v19 }
  0xd5   :  { %832 = vmatpush.msra.mxu2 %v688_v20 }
  0xd6   :  { %850 = vmatpush.msrb.mxu3 %v706_v21 }
  0xd7   :  { %833 = vmatpush.msra.mxu2 %v687_v22 }
  0xd8   :  { %851 = vmatpush.msrb.mxu3 %v705_v23 }
  0xd9   :  { %834 = vmatpush.msra.mxu2 %v686_v24 }
  0xda   :  { %852 = vmatpush.msrb.mxu3 %v704_v25  ;;  %835 = vmatmul.f32.vlgmr.msra.gmra.mxu2 %v731_v26 }
  0xdc   :  { %853 = vmatpush.msrb.mxu3 %v703_v27 }
  0xde   :  { %854 = vmatpush.msrb.mxu3 %v702_v28 }
  0xdf   :  { %855 = vmatmul.f32.vlgmr.msrb.gmra.mxu3 %v732_v29 }
 0x10c   :  { %v456_v31 = vpop.f32.mrf.mxu1 }
 0x10d   :  { %v457_v33 = vadd.f32 %v914_v30, %v456_v31 }
 0x114   :  { %v516_v34 = vpop.f32.mrf.mxu0 }
 0x11a   :  { %v476_v32 = vpop.f32.mrf.mxu2 }
 0x11b   :  { %v477_v35 = vadd.f32 %v476_v32, %v457_v33 }
 0x11e   :  { %v596_v44 = vpop.f32.mrf.mxu0 }
 0x122   :  { %v496_v36 = vpop.f32.mrf.mxu3  ;;  %v556_v40 = vpop.f32.mrf.mxu2 }
 0x123   :  { %v497_v37 = vadd.f32 %v496_v36, %v477_v35 }
 0x124   :  { %v536_v38 = vpop.f32.mrf.mxu1 }
 0x125   :  { %v517_v39 = vadd.f32 %v516_v34, %v497_v37 }
 0x127   :  { %v537_v41 = vadd.f32 %v536_v38, %v517_v39 }
 0x129   :  { %v557_v42 = vadd.f32 %v556_v40, %v537_v41 }
 0x12a   :  { %v576_v43 = vpop.f32.mrf.mxu3 }
 0x12b   :  { %v577_v45 = vadd.f32 %v576_v43, %v557_v42 }
 0x12c   :  { %v616_v46 = vpop.f32.mrf.mxu1 }
 0x12d   :  { %v597_v47 = vadd.f32 %v596_v44, %v577_v45 }
 0x12f   :  { %v617_v48 = vadd.f32 %v616_v46, %v597_v47 }
 0x131   :  { %619 = vst [vmem:[#allocation7] sm:$0xff] %v617_v48 }
 0x132   :  { %872 = dma.vmem_to_hbm [thread:$0]  %s868_s23, 128, %s870_s3, [#allocation4]  }
 0x13f   :  { %v796_v54 = vpop.f32.mrf.mxu0 }
 0x141   :  { %v756_v50 = vpop.f32.mrf.mxu2 }
 0x142   :  { %v757_v51 = vadd.f32 %v915_v49, %v756_v50 }
 0x146   :  { %v776_v52 = vpop.f32.mrf.mxu3 }
 0x147   :  { %v777_v53 = vadd.f32 %v776_v52, %v757_v51 }
 0x149   :  { %v797_v55 = vadd.f32 %v796_v54, %v777_v53 }
 0x14e   :  { %v816_v56 = vpop.f32.mrf.mxu1 }
 0x14f   :  { %v817_v57 = vadd.f32 %v816_v56, %v797_v55 }
 0x15d   :  { %v836_v58 = vpop.f32.mrf.mxu2 }
 0x15e   :  { %v837_v59 = vadd.f32 %v836_v58, %v817_v57 }
 0x162   :  { %v856_v60 = vpop.f32.mrf.mxu3 }
 0x163   :  { %v857_v61 = vadd.f32 %v856_v60, %v837_v59 }
 0x165   :  { %859 = vst [vmem:[#allocation8] sm:$0x3] %v857_v61 }
 0x166   :  { %883 = dma.vmem_to_hbm [thread:$0]  %s879_s27, 32, %s881_s29, [#allocation9]  }
 0x167   :  { %1016 = dma.done.wait [#allocation4], 128  }
 0x168   :  { %1017 = vsyncadd [#allocation4], 4294967168 }
 0x169   :  { %1018 = dma.done.wait [#allocation9], 32  }
 0x16a   :  { %1019 = vsyncadd [#allocation9], 4294967264 }
 0x16b   :  { %894 = vsyncpa [#allocation3], 1 }
 0x16c   :  { %895 = vsyncpa [#allocation6], 1 }
 0x16d   :  { %896 = vsyncpa [#allocation4], 1 }
 0x16e   :  { %897 = vsyncpa [#allocation9], 1 }

</bundles_post_ra>
